<compile_context>
chip_gen: v7x
topology: tpu7x:2x2x1
jax: 0.10.0
libtpu: 0.0.40
codegen_flags: <defaults>
</compile_context>

<pallas_src>
import jax
import jax.numpy as jnp
from jax import lax
from jax.experimental import pallas as pl
from jax.experimental.pallas import tpu as pltpu


def mlp_kernel(x_ref, w1_ref, b1_ref, w2_ref, b2_ref, w3t_ref, b3t_ref, o_ref):
    # Whole hot path (3 matmuls + 2 ReLUs + bias adds) fused in one grid step.
    # x arrives f32 and is cast to bf16 here (VPU has slack); accumulation is
    # f32 via preferred_element_type, biases are added in f32.
    x = x_ref[...].astype(w1_ref.dtype)
    h = jnp.dot(x, w1_ref[...], preferred_element_type=jnp.float32) + b1_ref[...]
    h = jnp.maximum(h, 0.0)
    h = jnp.dot(h.astype(w2_ref.dtype), w2_ref[...],
                preferred_element_type=jnp.float32) + b2_ref[...]
    h = jnp.maximum(h, 0.0)
    # Final layer computed transposed (q·k^T-style contraction on the shared
    # h2 axis): (n_out, h2) x (tb, h2) -> (n_out, tb). For n_out==1 this makes
    # the store a lane-dense (1, tb) row instead of a 1-lane-wide column.
    o = lax.dot_general(
        w3t_ref[...], h.astype(w3t_ref.dtype),
        dimension_numbers=(((1,), (1,)), ((), ())),
        preferred_element_type=jnp.float32) + b3t_ref[...]
    o_ref[...] = o.astype(o_ref.dtype)


def _pick_batch_tile(B):
    """Batch tile heuristic.

    Small B: one full-batch step (per-step overhead dominates on single-TC
    v5e/v6e and the whole problem is only ~100s of KB).
    Large B (>=4096): >=4 grid steps of 512-2048 rows so v7x's two TensorCores
    each get >=2 steps and can overlap their x/out DMAs with compute.
    All tile candidates are multiples of 128 (keeps the lane-dense out block
    legal and the x block 8-aligned).
    """
    if B < 4096:
        return B
    for tb in (2048, 1024, 512, 256, 128):
        if B % tb == 0 and B // tb >= 4:
            return tb
    return B


def prepare_params(params, compute_dtype=jnp.bfloat16):
    """One-time param prep (casts + last-layer transpose), hoisted out of the
    per-call path so the forward launches a single XLA op."""
    return {
        "w1": params["w1"].astype(compute_dtype),              # [n_in, h1]
        "b1": params["b1"].reshape(1, -1).astype(jnp.float32),  # [1, h1]
        "w2": params["w2"].astype(compute_dtype),              # [h1, h2]
        "b2": params["b2"].reshape(1, -1).astype(jnp.float32),  # [1, h2]
        "w3t": params["w3"].T.astype(compute_dtype),            # [n_out, h2]
        "b3t": params["b3"].reshape(-1, 1).astype(jnp.float32),  # [n_out, 1]
    }


def mlp_1to1first_forward(x, prepared, *, batch_tile=None):
    """Fused MLP forward.

    x: [B, n_in] float32
    prepared: output of prepare_params()
    returns: [B, n_out] float32
    """
    B, n_in = x.shape
    h1 = prepared["w1"].shape[1]
    h2 = prepared["w2"].shape[1]
    n_out = prepared["w3t"].shape[0]

    tb = _pick_batch_tile(B) if batch_tile is None else batch_tile
    # (8,128) block rule: a partial-batch tile must be 128-aligned (covers the
    # 8-alignment of the x block and the lane-density of the out block).
    assert B % tb == 0 and (tb == B or tb % 128 == 0), \
        f"batch_tile {tb} must divide B={B} and be a multiple of 128 (or equal B)"
    grid = (B // tb,)

    # Honest VMEM budget: double-buffered x/out tiles + (default double-
    # buffered) resident weights/biases + slop for f32 intermediates.
    need = (2 * tb * n_in * 4                                   # x tiles (f32)
            + 2 * n_out * tb * 4                                # out tiles (f32)
            + 2 * (n_in * h1 + h1 * h2 + n_out * h2) * 2        # bf16 weights
            + 2 * (h1 + h2 + n_out) * 4                         # f32 biases
            + 2 * tb * (h1 + h2) * 4)                           # f32 hidden intermediates
    vmem_limit = int(min(max(need + (4 << 20), 16 << 20), 32 << 20))

    in_specs = [
        pl.BlockSpec((tb, n_in), lambda i: (i, 0)),        # x tile (f32 stream)
        pl.BlockSpec((n_in, h1), lambda i: (0, 0)),        # w1 (resident)
        pl.BlockSpec((1, h1), lambda i: (0, 0)),           # b1
        pl.BlockSpec((h1, h2), lambda i: (0, 0)),          # w2
        pl.BlockSpec((1, h2), lambda i: (0, 0)),           # b2
        pl.BlockSpec((n_out, h2), lambda i: (0, 0)),       # w3^T
        pl.BlockSpec((n_out, 1), lambda i: (0, 0)),        # b3^T
    ]
    # Transposed, lane-dense output: (n_out, B) with a (n_out, tb) block per step.
    out_spec = pl.BlockSpec((n_out, tb), lambda i: (0, i))

    out_t = pl.pallas_call(
        mlp_kernel,
        out_shape=jax.ShapeDtypeStruct((n_out, B), jnp.float32),
        grid=grid,
        in_specs=in_specs,
        out_specs=out_spec,
        compiler_params=pltpu.CompilerParams(
            dimension_semantics=("parallel",),
            vmem_limit_bytes=vmem_limit,
        ),
    )(x, prepared["w1"], prepared["b1"], prepared["w2"], prepared["b2"],
      prepared["w3t"], prepared["b3t"])

    # Free for n_out == 1 (degenerate-dim transpose); real transpose otherwise.
    return out_t.T


def init_params(key, n_inputs, hidden_sizes, n_output, dtype=jnp.float32):
    """Deterministic synthetic init (uniform, fan-in scaled - mirrors nn.Linear)."""
    sizes = [n_inputs] + list(hidden_sizes) + [n_output]
    params = {}
    for idx, (fan_in, fan_out) in enumerate(zip(sizes[:-1], sizes[1:]), start=1):
        key, kw, kb = jax.random.split(key, 3)
        bound = 1.0 / jnp.sqrt(jnp.asarray(fan_in, dtype))
        params[f"w{idx}"] = jax.random.uniform(
            kw, (fan_in, fan_out), dtype, minval=-bound, maxval=bound)
        params[f"b{idx}"] = jax.random.uniform(
            kb, (1, fan_out), dtype, minval=-bound, maxval=bound)
    return params


def mlp_ref(x, params):
    """Pure-JAX f32 reference for the correctness check."""
    h = jnp.maximum(x @ params["w1"] + params["b1"], 0.0)
    h = jnp.maximum(h @ params["w2"] + params["b2"], 0.0)
    return h @ params["w3"] + params["b3"]


if __name__ == "__main__":
    # MLP_1to1first(n_inputs=32, layer_num=3, hidden_sizes=[64, 32], n_output=1)
    B, N_IN = 256, 32
    HIDDEN = [64, 32]
    N_OUT = 1

    key = jax.random.PRNGKey(0)
    key, kx = jax.random.split(key)
    x = jax.random.normal(kx, (B, N_IN), jnp.float32)

    params = init_params(key, N_IN, HIDDEN, N_OUT)
    prepared = prepare_params(params)   # one-time cast/transpose, off the hot path

    out = mlp_1to1first_forward(x, prepared)
    out = jax.block_until_ready(out)

    ref = mlp_ref(x, params)
    assert out.shape == (B, N_OUT), f"bad shape {out.shape}"
    # bf16 matmul inputs with f32 accumulation over K<=64 -> relaxed tolerance.
    assert jnp.allclose(out, ref, atol=5e-2, rtol=5e-2), "mismatch vs reference"

    print("KERNEL_OK")
</pallas_src>

<mosaic_0001>
module attributes {stable_mosaic.version = 11 : i64} {
  func.func @mlp_kernel(%arg0: i32, %arg1: memref<256x32xf32, #tpu.memory_space<vmem>>, %arg2: memref<32x64xbf16, #tpu.memory_space<vmem>>, %arg3: memref<1x64xf32, #tpu.memory_space<vmem>>, %arg4: memref<64x32xbf16, #tpu.memory_space<vmem>>, %arg5: memref<1x32xf32, #tpu.memory_space<vmem>>, %arg6: memref<1x32xbf16, #tpu.memory_space<vmem>>, %arg7: memref<1x1xf32, #tpu.memory_space<vmem>>, %arg8: memref<1x256xf32, #tpu.memory_space<vmem>>) attributes {dimension_semantics = [#tpu.dimension_semantics<parallel>], iteration_bounds = array<i64: 1>, scalar_prefetch = 0 : i64, scratch_operands = 0 : i64, tpu.core_type = #tpu.core_type<tc>, window_params = [{transform_indices = @transform_0, window_bounds = array<i64: 256, 32>}, {pipeline_mode = #tpu.pipeline_mode<synchronous>, transform_indices = @transform_1, window_bounds = array<i64: 32, 64>}, {pipeline_mode = #tpu.pipeline_mode<synchronous>, transform_indices = @transform_2, window_bounds = array<i64: 1, 64>}, {pipeline_mode = #tpu.pipeline_mode<synchronous>, transform_indices = @transform_3, window_bounds = array<i64: 64, 32>}, {pipeline_mode = #tpu.pipeline_mode<synchronous>, transform_indices = @transform_4, window_bounds = array<i64: 1, 32>}, {pipeline_mode = #tpu.pipeline_mode<synchronous>, transform_indices = @transform_5, window_bounds = array<i64: 1, 32>}, {pipeline_mode = #tpu.pipeline_mode<synchronous>, transform_indices = @transform_6, window_bounds = array<i64: 1, 1>}, {transform_indices = @transform_7, window_bounds = array<i64: 1, 256>}]} {
    %c0 = arith.constant 0 : index
    %c0_0 = arith.constant 0 : index
    %0 = vector.load %arg1[%c0, %c0_0] : memref<256x32xf32, #tpu.memory_space<vmem>>, vector<256x32xf32>
    %1 = arith.truncf %0 : vector<256x32xf32> to vector<256x32xbf16>
    %c0_1 = arith.constant 0 : index
    %c0_2 = arith.constant 0 : index
    %2 = vector.load %arg2[%c0_1, %c0_2] : memref<32x64xbf16, #tpu.memory_space<vmem>>, vector<32x64xbf16>
    %cst = arith.constant dense<0.000000e+00> : vector<256x64xf32>
    %3 = tpu.matmul %1, %2, %cst {dimension_numbers = #tpu.dot_dimension_numbers<[1], [0], [0], [1], [0, 0, 1, 1], [], []>} : vector<256x32xbf16>, vector<32x64xbf16>, vector<256x64xf32> -> vector<256x64xf32>
    %c0_3 = arith.constant 0 : index
    %c0_4 = arith.constant 0 : index
    %4 = vector.load %arg3[%c0_3, %c0_4] : memref<1x64xf32, #tpu.memory_space<vmem>>, vector<1x64xf32>
    %5 = vector.broadcast %4 : vector<1x64xf32> to vector<256x64xf32>
    %6 = arith.addf %3, %5 : vector<256x64xf32>
    %cst_5 = arith.constant 0.000000e+00 : f32
    %7 = vector.broadcast %cst_5 : f32 to vector<256x64xf32>
    %8 = arith.maximumf %6, %7 : vector<256x64xf32>
    %9 = arith.truncf %8 : vector<256x64xf32> to vector<256x64xbf16>
    %c0_6 = arith.constant 0 : index
    %c0_7 = arith.constant 0 : index
    %10 = vector.load %arg4[%c0_6, %c0_7] : memref<64x32xbf16, #tpu.memory_space<vmem>>, vector<64x32xbf16>
    %cst_8 = arith.constant dense<0.000000e+00> : vector<256x32xf32>
    %11 = tpu.matmul %9, %10, %cst_8 {dimension_numbers = #tpu.dot_dimension_numbers<[1], [0], [0], [1], [0, 0, 1, 1], [], []>} : vector<256x64xbf16>, vector<64x32xbf16>, vector<256x32xf32> -> vector<256x32xf32>
    %c0_9 = arith.constant 0 : index
    %c0_10 = arith.constant 0 : index
    %12 = vector.load %arg5[%c0_9, %c0_10] : memref<1x32xf32, #tpu.memory_space<vmem>>, vector<1x32xf32>
    %13 = vector.broadcast %12 : vector<1x32xf32> to vector<256x32xf32>
    %14 = arith.addf %11, %13 : vector<256x32xf32>
    %cst_11 = arith.constant 0.000000e+00 : f32
    %15 = vector.broadcast %cst_11 : f32 to vector<256x32xf32>
    %16 = arith.maximumf %14, %15 : vector<256x32xf32>
    %c0_12 = arith.constant 0 : index
    %c0_13 = arith.constant 0 : index
    %17 = vector.load %arg6[%c0_12, %c0_13] : memref<1x32xbf16, #tpu.memory_space<vmem>>, vector<1x32xbf16>
    %18 = arith.truncf %16 : vector<256x32xf32> to vector<256x32xbf16>
    %cst_14 = arith.constant dense<0.000000e+00> : vector<1x256xf32>
    %19 = tpu.matmul %17, %18, %cst_14 {dimension_numbers = #tpu.dot_dimension_numbers<[1], [1], [0], [0], [0, 0, 1, 0], [], []>} : vector<1x32xbf16>, vector<256x32xbf16>, vector<1x256xf32> -> vector<1x256xf32>
    %c0_15 = arith.constant 0 : index
    %c0_16 = arith.constant 0 : index
    %20 = vector.load %arg7[%c0_15, %c0_16] : memref<1x1xf32, #tpu.memory_space<vmem>>, vector<1x1xf32>
    %21 = vector.broadcast %20 : vector<1x1xf32> to vector<1x256xf32>
    %22 = arith.addf %19, %21 : vector<1x256xf32>
    %c0_17 = arith.constant 0 : index
    %c0_18 = arith.constant 0 : index
    %23 = vector.load %arg8[%c0_17, %c0_18] : memref<1x256xf32, #tpu.memory_space<vmem>>, vector<1x256xf32>
    tpu.vector_store %arg8[%c0_17, %c0_18], %22 {strides = array<i32>} : memref<1x256xf32, #tpu.memory_space<vmem>>, vector<1x256xf32>,
    return
  }
  func.func @transform_0(%arg0: i32) -> (i32, i32) {
    %c0_i32 = arith.constant 0 : i32
    %c0_i32_0 = arith.constant 0 : i32
    return %arg0, %c0_i32 : i32, i32
  }
  func.func @transform_1(%arg0: i32) -> (i32, i32) {
    %c0_i32 = arith.constant 0 : i32
    %c0_i32_0 = arith.constant 0 : i32
    %c0_i32_1 = arith.constant 0 : i32
    return %c0_i32, %c0_i32_0 : i32, i32
  }
  func.func @transform_2(%arg0: i32) -> (i32, i32) {
    %c0_i32 = arith.constant 0 : i32
    %c0_i32_0 = arith.constant 0 : i32
    %c0_i32_1 = arith.constant 0 : i32
    return %c0_i32, %c0_i32_0 : i32, i32
  }
  func.func @transform_3(%arg0: i32) -> (i32, i32) {
    %c0_i32 = arith.constant 0 : i32
    %c0_i32_0 = arith.constant 0 : i32
    %c0_i32_1 = arith.constant 0 : i32
    return %c0_i32, %c0_i32_0 : i32, i32
  }
  func.func @transform_4(%arg0: i32) -> (i32, i32) {
    %c0_i32 = arith.constant 0 : i32
    %c0_i32_0 = arith.constant 0 : i32
    %c0_i32_1 = arith.constant 0 : i32
    return %c0_i32, %c0_i32_0 : i32, i32
  }
  func.func @transform_5(%arg0: i32) -> (i32, i32) {
    %c0_i32 = arith.constant 0 : i32
    %c0_i32_0 = arith.constant 0 : i32
    %c0_i32_1 = arith.constant 0 : i32
    return %c0_i32, %c0_i32_0 : i32, i32
  }
  func.func @transform_6(%arg0: i32) -> (i32, i32) {
    %c0_i32 = arith.constant 0 : i32
    %c0_i32_0 = arith.constant 0 : i32
    %c0_i32_1 = arith.constant 0 : i32
    return %c0_i32, %c0_i32_0 : i32, i32
  }
  func.func @transform_7(%arg0: i32) -> (i32, i32) {
    %c0_i32 = arith.constant 0 : i32
    %c0_i32_0 = arith.constant 0 : i32
    return %c0_i32, %arg0 : i32, i32
  }
}

</mosaic_0001>

<bundles_post_ra>
// kernel: tpu_custom_call.1
= control target key start
LH: loop header
LB: loop body
LE: loop exit
PB: predicated region body
PF: predicated region fallthrough
CT: control target
= control target key end

     0   :  { %s1338_s0 = inlined_call_operand.vmem [shape: f32[256,32], index: 0, kind: input, shape index: {}]   ;;  %s1339_s1 = inlined_call_operand.vmem [shape: bf16[32,64], index: 1, kind: input, shape index: {}]   ;;  %s1340_s2 = inlined_call_operand.vmem [shape: f32[1,64], index: 2, kind: input, shape index: {}]   ;;  %s1341_s3 = inlined_call_operand.vmem [shape: bf16[64,32], index: 3, kind: input, shape index: {}]   ;;  %s1342_s4 = inlined_call_operand.vmem [shape: f32[1,32], index: 4, kind: input, shape index: {}]   ;;  %s1343_s5 = inlined_call_operand.vmem [shape: bf16[1,32], index: 5, kind: input, shape index: {}]   ;;  %s1344_s6 = inlined_call_operand.<no memory space> [shape: f32[1,1], index: 6, kind: input, shape index: {}]   ;;  %s1345_s7 = inlined_call_operand.hbm [shape: f32[1,256], index: 7, kind: output, shape index: {}]  }
   0x1   :  { %v12_v0 = vstv %s1344_s6 }
   0x2   :  { %13 = vst [vmem:[#allocation2] sm:$0x1] %v12_v0 }
   0x3   :  { %v981_v1 = vld [vmem:[%s1339_s1] sm:$0xff]   ;;  %v982_v2 = vld [vmem:[%s1339_s1 + $0x8] sm:$0xff]   ;;  %vm101_vm0 = vcmask 261120   ;;  %v32_v6 = vld [vmem:[%s1338_s0 + $0x10] sm:$0xff] }
   0x4   :  { %893 = vmatprep.subr.bf16.mxu0 %v981_v1  ;;  %v30_v3 = vld [vmem:[%s1338_s0] sm:$0xff]  ;;  %v31_v4 = vld [vmem:[%s1338_s0 + $0x8] sm:$0xff]  ;;  %v33_v7 = vld [vmem:[%s1338_s0 + $0x18] sm:$0xff] }
   0x5   :  { %894 = vmatpush3.bf16.msra.mxu0 %v981_v1  ;;  %v62_v5 = vpack.c.bf16 %v31_v4, %v30_v3  ;;  %v34_v8 = vld [vmem:[%s1338_s0 + $0x20] sm:$0xff]  ;;  %v35_v9 = vld [vmem:[%s1338_s0 + $0x28] sm:$0xff]  ;;  %v63_v10 = vpack.c.bf16 %v33_v7, %v32_v6  ;;  %v36_v12 = vld [vmem:[%s1338_s0 + $0x30] sm:$0xff] }
   0x6   :  { %895 = vmatprep.subr.bf16.mxu0 %v982_v2  ;;  %v64_v11 = vpack.c.bf16 %v35_v9, %v34_v8  ;;  %v37_v13 = vld [vmem:[%s1338_s0 + $0x38] sm:$0xff]  ;;  %v38_v14 = vld [vmem:[%s1338_s0 + $0x40] sm:$0xff]  ;;  %v39_v15 = vld [vmem:[%s1338_s0 + $0x48] sm:$0xff] }
   0x7   :  { %897 = vmatprep.mubr.msk.bf16.mxu0 %vm101_vm0, %v62_v5  ;;  %v983_v16 = vld [vmem:[%s1341_s3] sm:$0xff]   ;;  %v65_v17 = vpack.c.bf16 %v37_v13, %v36_v12  ;;  %v984_v18 = vld [vmem:[%s1341_s3 + $0x8] sm:$0xff]   ;;  %v66_v19 = vpack.c.bf16 %v39_v15, %v38_v14 }
   0x8   :  { %929 = vmatprep.subr.bf16.mxu1 %v983_v16 }
   0x9   :  { %896 = vmatpush3.bf16.msra.mxu0 %v982_v2  ;;  %930 = vmatpush3.bf16.msra.mxu1 %v983_v16 }
   0xc   :  { %898 = vmatmul.mubr.msk.bf16.vlgmr.msra.gmra.mrb[0].mxu0 %vm101_vm0, %v63_v10 }
   0xd   :  { %901 = vmatprep.mubr.msk.bf16.mxu0 %vm101_vm0, %v64_v11 }
   0xe   :  { %14 = vsyncpa [#allocation4], 0  ;;  %931 = vmatprep.subr.bf16.mxu1 %v984_v18  ;;  %v40_v20 = vld [vmem:[%s1338_s0 + $0x50] sm:$0xff]  ;;  %v41_v21 = vld [vmem:[%s1338_s0 + $0x58] sm:$0xff]  ;;  %vm398_vm1 = vcmask 523264  }
   0xf   :  { %v42_v22 = vld [vmem:[%s1338_s0 + $0x60] sm:$0xff]  ;;  %v43_v23 = vld [vmem:[%s1338_s0 + $0x68] sm:$0xff]  ;;  %932 = vmatpush3.bf16.msra.mxu1 %v984_v18  ;;  %v67_v24 = vpack.c.bf16 %v41_v21, %v40_v20  ;;  %v44_v26 = vld [vmem:[%s1338_s0 + $0x70] sm:$0xff] }
  0x10   :  { %v68_v25 = vpack.c.bf16 %v43_v23, %v42_v22  ;;  %v45_v27 = vld [vmem:[%s1338_s0 + $0x78] sm:$0xff]  ;;  %v46_v28 = vld [vmem:[%s1338_s0 + $0x80] sm:$0xff]  ;;  %v47_v29 = vld [vmem:[%s1338_s0 + $0x88] sm:$0xff] }
  0x11   :  { %v69_v30 = vpack.c.bf16 %v45_v27, %v44_v26  ;;  %v70_v31 = vpack.c.bf16 %v47_v29, %v46_v28  ;;  %v48_v32 = vld [vmem:[%s1338_s0 + $0x90] sm:$0xff]  ;;  %v49_v33 = vld [vmem:[%s1338_s0 + $0x98] sm:$0xff]  ;;  %v50_v34 = vld [vmem:[%s1338_s0 + $0xa0] sm:$0xff] }
  0x12   :  { %v51_v35 = vld [vmem:[%s1338_s0 + $0xa8] sm:$0xff]  ;;  %v71_v36 = vpack.c.bf16 %v49_v33, %v48_v32  ;;  %v52_v38 = vld [vmem:[%s1338_s0 + $0xb0] sm:$0xff]  ;;  %v53_v39 = vld [vmem:[%s1338_s0 + $0xb8] sm:$0xff] }
  0x13   :  { %v72_v37 = vpack.c.bf16 %v51_v35, %v50_v34  ;;  %v54_v40 = vld [vmem:[%s1338_s0 + $0xc0] sm:$0xff]  ;;  %v55_v41 = vld [vmem:[%s1338_s0 + $0xc8] sm:$0xff]  ;;  %v73_v42 = vpack.c.bf16 %v53_v39, %v52_v38  ;;  %v56_v44 = vld [vmem:[%s1338_s0 + $0xd0] sm:$0xff] }
  0x14   :  { %902 = vmatmul.mubr.msk.bf16.gmra.mrb[4].mxu0 %vm101_vm0, %v65_v17  ;;  %v74_v43 = vpack.c.bf16 %v55_v41, %v54_v40  ;;  %v57_v45 = vld [vmem:[%s1338_s0 + $0xd8] sm:$0xff]  ;;  %v58_v46 = vld [vmem:[%s1338_s0 + $0xe0] sm:$0xff]  ;;  %v59_v47 = vld [vmem:[%s1338_s0 + $0xe8] sm:$0xff] }
  0x15   :  { %905 = vmatprep.mubr.msk.bf16.mxu0 %vm101_vm0, %v66_v19  ;;  %v75_v48 = vpack.c.bf16 %v57_v45, %v56_v44  ;;  %v76_v49 = vpack.c.bf16 %v59_v47, %v58_v46  ;;  %v60_v50 = vld [vmem:[%s1338_s0 + $0xf0] sm:$0xff]  ;;  %v61_v51 = vld [vmem:[%s1338_s0 + $0xf8] sm:$0xff]  ;;  %v1190_v55 = vld [vmem:[%s1340_s2] ss:$0 sm:$0xff] }
  0x16   :  { %v77_v52 = vpack.c.bf16 %v61_v51, %v60_v50  ;;  %v985_v53 = vld [vmem:[%s1341_s3 + $0x10] sm:$0xff]   ;;  %v986_v54 = vld [vmem:[%s1341_s3 + $0x18] sm:$0xff]  }
  0x17   :  { %933 = vmatprep.subr.bf16.mxu1 %v985_v53 }
  0x18   :  { %934 = vmatpush3.bf16.msra.mxu1 %v985_v53 }
  0x19   :  { %935 = vmatprep.subr.bf16.mxu1 %v986_v54 }
  0x1c   :  { %906 = vmatmul.mubr.msk.bf16.gmra.mrb[8].mxu0 %vm101_vm0, %v67_v24  ;;  %936 = vmatpush3.bf16.msra.mxu1 %v986_v54 }
  0x1d   :  { %909 = vmatprep.mubr.msk.bf16.mxu0 %vm101_vm0, %v68_v25 }
  0x24   :  { %910 = vmatmul.mubr.msk.bf16.gmra.mrb[12].mxu0 %vm101_vm0, %v69_v30 }
  0x25   :  { %913 = vmatprep.mubr.msk.bf16.mxu0 %vm101_vm0, %v70_v31 }
  0x2c   :  { %914 = vmatmul.mubr.msk.bf16.gmra.mrb[16].mxu0 %vm101_vm0, %v71_v36 }
  0x2d   :  { %917 = vmatprep.mubr.msk.bf16.mxu0 %vm101_vm0, %v72_v37 }
  0x34   :  { %918 = vmatmul.mubr.msk.bf16.gmra.mrb[20].mxu0 %vm101_vm0, %v73_v42 }
  0x35   :  { %921 = vmatprep.mubr.msk.bf16.mxu0 %vm101_vm0, %v74_v43 }
  0x3c   :  { %922 = vmatmul.mubr.msk.bf16.gmra.mrb[24].mxu0 %vm101_vm0, %v75_v48 }
  0x3d   :  { %925 = vmatprep.mubr.msk.bf16.mxu0 %vm101_vm0, %v76_v49 }
  0x44   :  { %926 = vmatmul.mubr.msk.bf16.gmra.mrb[28].mxu0 %vm101_vm0, %v77_v52 }
  0xdf   :  { %v899_v56 = vpop.f32.mrb[0].mxu0 }
  0xe0   :  { %v193_v57 = vadd.f32 %v899_v56, %v1190_v55  ;;  %v184_v58 = vpop.f32.mrb[1].mxu0 }
  0xe1   :  { %v185_v59 = vadd.f32 %v1190_v55, %v184_v58  ;;  %v900_v60 = vpop.f32.mrb[2].mxu0 }
  0xe2   :  { %v196_v61 = vadd.f32 %v900_v60, %v1190_v55  ;;  %v187_v62 = vpop.f32.mrb[3].mxu0  ;;  %v313_v0 = vmax.f32 %v193_v57, 0.0 }
  0xe3   :  { %v188_v63 = vadd.f32 %v1190_v55, %v187_v62  ;;  %v311_v2 = vmax.f32 %v185_v59, 0.0 }
  0xe4   :  { %v314_v1 = vmax.f32 %v196_v61, 0.0 }
  0xe5   :  { %v312_v3 = vmax.f32 %v188_v63, 0.0 }
  0xe6   :  { %v344_v4 = vpack.c.bf16 %v314_v1, %v313_v0 }
  0xe7   :  { %v903_v5 = vpop.f32.mrb[4].mxu0  ;;  %v343_v6 = vpack.c.bf16 %v312_v3, %v311_v2 }
  0xe8   :  { %v209_v7 = vadd.f32 %v903_v5, %v1190_v55  ;;  %v200_v8 = vpop.f32.mrb[5].mxu0 }
  0xe9   :  { %v201_v9 = vadd.f32 %v1190_v55, %v200_v8  ;;  %v904_v10 = vpop.f32.mrb[6].mxu0  ;;  %937 = vmatprep.mubr.msk.bf16.mxu1 %vm398_vm1, %v343_v6 }
  0xea   :  { %v212_v11 = vadd.f32 %v904_v10, %v1190_v55  ;;  %v203_v12 = vpop.f32.mrb[7].mxu0  ;;  %938 = vmatmul.mubr.msk.bf16.vlgmr.msra.gmra.mrb[0].mxu1 %vm398_vm1, %v344_v4  ;;  %v317_v14 = vmax.f32 %v209_v7, 0.0 }
  0xeb   :  { %v204_v13 = vadd.f32 %v1190_v55, %v203_v12  ;;  %v315_v16 = vmax.f32 %v201_v9, 0.0 }
  0xec   :  { %v318_v15 = vmax.f32 %v212_v11, 0.0 }
  0xed   :  { %v316_v17 = vmax.f32 %v204_v13, 0.0 }
  0xee   :  { %v346_v18 = vpack.c.bf16 %v318_v15, %v317_v14 }
  0xef   :  { %v345_v19 = vpack.c.bf16 %v316_v17, %v315_v16  ;;  %v907_v20 = vpop.f32.mrb[8].mxu0 }
  0xf0   :  { %v225_v21 = vadd.f32 %v907_v20, %v1190_v55  ;;  %v216_v22 = vpop.f32.mrb[9].mxu0 }
  0xf1   :  { %v217_v23 = vadd.f32 %v1190_v55, %v216_v22  ;;  %v908_v24 = vpop.f32.mrb[10].mxu0  ;;  %941 = vmatprep.mubr.msk.bf16.mxu1 %vm398_vm1, %v345_v19 }
  0xf2   :  { %v228_v25 = vadd.f32 %v908_v24, %v1190_v55  ;;  %v219_v26 = vpop.f32.mrb[11].mxu0  ;;  %942 = vmatmul.mubr.msk.bf16.gmra.mrb[4].mxu1 %vm398_vm1, %v346_v18  ;;  %v321_v28 = vmax.f32 %v225_v21, 0.0 }
  0xf3   :  { %v220_v27 = vadd.f32 %v1190_v55, %v219_v26  ;;  %v319_v30 = vmax.f32 %v217_v23, 0.0 }
  0xf4   :  { %v322_v29 = vmax.f32 %v228_v25, 0.0 }
  0xf5   :  { %v320_v31 = vmax.f32 %v220_v27, 0.0 }
  0xf6   :  { %v348_v32 = vpack.c.bf16 %v322_v29, %v321_v28 }
  0xf7   :  { %v347_v33 = vpack.c.bf16 %v320_v31, %v319_v30  ;;  %v911_v34 = vpop.f32.mrb[12].mxu0 }
  0xf8   :  { %v241_v35 = vadd.f32 %v911_v34, %v1190_v55  ;;  %v232_v36 = vpop.f32.mrb[13].mxu0 }
  0xf9   :  { %v233_v37 = vadd.f32 %v1190_v55, %v232_v36  ;;  %v912_v38 = vpop.f32.mrb[14].mxu0  ;;  %945 = vmatprep.mubr.msk.bf16.mxu1 %vm398_vm1, %v347_v33 }
  0xfa   :  { %v244_v39 = vadd.f32 %v912_v38, %v1190_v55  ;;  %v235_v40 = vpop.f32.mrb[15].mxu0  ;;  %946 = vmatmul.mubr.msk.bf16.gmra.mrb[8].mxu1 %vm398_vm1, %v348_v32  ;;  %v325_v42 = vmax.f32 %v241_v35, 0.0 }
  0xfb   :  { %v236_v41 = vadd.f32 %v1190_v55, %v235_v40  ;;  %v323_v44 = vmax.f32 %v233_v37, 0.0 }
  0xfc   :  { %v326_v43 = vmax.f32 %v244_v39, 0.0 }
  0xfd   :  { %v324_v45 = vmax.f32 %v236_v41, 0.0  ;;  %v1243_v41 = vld [vmem:[%s1343_s5] sm:$0x1] }
  0xfe   :  { %v350_v46 = vpack.c.bf16 %v326_v43, %v325_v42  ;;  %891 = vmatprep.mubr.msk.bf16.mxu0 %vm101_vm0, %v1243_v41  ;;  %v657_v42 = vld [vmem:[#allocation2] sm:$0x1]  ;;  %v1011_v43 = vmov 0  }
  0xff   :  { %v349_v47 = vpack.c.bf16 %v324_v45, %v323_v44  ;;  %v915_v48 = vpop.f32.mrb[16].mxu0  ;;  %980 = vset.pattern.permute.xlu0 %v1011_v43 }
 0x100   :  { %v257_v49 = vadd.f32 %v915_v48, %v1190_v55  ;;  %v248_v50 = vpop.f32.mrb[17].mxu0  ;;  %660 = vperm.xlu0 %980, %v657_v42  }
 0x101   :  { %v249_v51 = vadd.f32 %v1190_v55, %v248_v50  ;;  %v916_v52 = vpop.f32.mrb[18].mxu0  ;;  %949 = vmatprep.mubr.msk.bf16.mxu1 %vm398_vm1, %v349_v47 }
 0x102   :  { %v260_v53 = vadd.f32 %v916_v52, %v1190_v55  ;;  %v251_v54 = vpop.f32.mrb[19].mxu0  ;;  %950 = vmatmul.mubr.msk.bf16.gmra.mrb[12].mxu1 %vm398_vm1, %v350_v46  ;;  %v329_v57 = vmax.f32 %v257_v49, 0.0 }
 0x103   :  { %v252_v56 = vadd.f32 %v1190_v55, %v251_v54  ;;  %v327_v59 = vmax.f32 %v249_v51, 0.0 }
 0x104   :  { %v330_v58 = vmax.f32 %v260_v53, 0.0 }
 0x105   :  { %v328_v60 = vmax.f32 %v252_v56, 0.0 }
 0x106   :  { %v352_v61 = vpack.c.bf16 %v330_v58, %v329_v57 }
 0x107   :  { %v351_v62 = vpack.c.bf16 %v328_v60, %v327_v59  ;;  %v919_v63 = vpop.f32.mrb[20].mxu0 }
 0x108   :  { %v273_v0 = vadd.f32 %v919_v63, %v1190_v55  ;;  %v264_v1 = vpop.f32.mrb[21].mxu0 }
 0x109   :  { %v265_v2 = vadd.f32 %v1190_v55, %v264_v1  ;;  %953 = vmatprep.mubr.msk.bf16.mxu1 %vm398_vm1, %v351_v62  ;;  %v920_v3 = vpop.f32.mrb[22].mxu0 }
 0x10a   :  { %v333_v4 = vmax.f32 %v273_v0, 0.0  ;;  %v276_v5 = vadd.f32 %v920_v3, %v1190_v55  ;;  %954 = vmatmul.mubr.msk.bf16.gmra.mrb[16].mxu1 %vm398_vm1, %v352_v61  ;;  %v267_v6 = vpop.f32.mrb[23].mxu0 }
 0x10b   :  { %v331_v7 = vmax.f32 %v265_v2, 0.0  ;;  %v268_v8 = vadd.f32 %v1190_v55, %v267_v6 }
 0x10c   :  { %v334_v9 = vmax.f32 %v276_v5, 0.0 }
 0x10d   :  { %v332_v10 = vmax.f32 %v268_v8, 0.0 }
 0x10e   :  { %v354_v11 = vpack.c.bf16 %v334_v9, %v333_v4 }
 0x10f   :  { %v353_v12 = vpack.c.bf16 %v332_v10, %v331_v7  ;;  %v923_v13 = vpop.f32.mrb[24].mxu0 }
 0x110   :  { %v289_v14 = vadd.f32 %v923_v13, %v1190_v55  ;;  %v280_v15 = vpop.f32.mrb[25].mxu0 }
 0x111   :  { %957 = vmatprep.mubr.msk.bf16.mxu1 %vm398_vm1, %v353_v12  ;;  %v281_v16 = vadd.f32 %v1190_v55, %v280_v15  ;;  %v924_v17 = vpop.f32.mrb[26].mxu0 }
 0x112   :  { %958 = vmatmul.mubr.msk.bf16.gmra.mrb[20].mxu1 %vm398_vm1, %v354_v11  ;;  %v337_v18 = vmax.f32 %v289_v14, 0.0  ;;  %v292_v19 = vadd.f32 %v924_v17, %v1190_v55  ;;  %v283_v20 = vpop.f32.mrb[27].mxu0 }
 0x113   :  { %v335_v21 = vmax.f32 %v281_v16, 0.0  ;;  %v284_v22 = vadd.f32 %v1190_v55, %v283_v20 }
 0x114   :  { %v338_v23 = vmax.f32 %v292_v19, 0.0 }
 0x115   :  { %v336_v24 = vmax.f32 %v284_v22, 0.0 }
 0x116   :  { %v356_v25 = vpack.c.bf16 %v338_v23, %v337_v18 }
 0x117   :  { %v355_v26 = vpack.c.bf16 %v336_v24, %v335_v21  ;;  %v927_v27 = vpop.f32.mrb[28].mxu0 }
 0x118   :  { %v305_v28 = vadd.f32 %v927_v27, %v1190_v55  ;;  %v296_v29 = vpop.f32.mrb[29].mxu0 }
 0x119   :  { %961 = vmatprep.mubr.msk.bf16.mxu1 %vm398_vm1, %v355_v26  ;;  %v297_v30 = vadd.f32 %v1190_v55, %v296_v29  ;;  %v928_v31 = vpop.f32.mrb[30].mxu0 }
 0x11a   :  { %962 = vmatmul.mubr.msk.bf16.gmra.mrb[24].mxu1 %vm398_vm1, %v356_v25  ;;  %v341_v32 = vmax.f32 %v305_v28, 0.0  ;;  %v308_v33 = vadd.f32 %v928_v31, %v1190_v55  ;;  %v299_v34 = vpop.f32.mrb[31].mxu0 }
 0x11b   :  { %v339_v35 = vmax.f32 %v297_v30, 0.0  ;;  %v300_v36 = vadd.f32 %v1190_v55, %v299_v34  ;;  %v1250_v55 = vld [vmem:[%s1342_s4] ss:$0 sm:$0xff]  ;;  %s1013_s4 = smov [#allocation3]  }
 0x11c   :  { %v342_v37 = vmax.f32 %v308_v33, 0.0  ;;  %s788_s5 = sshll.u32 %s1013_s4, 4  ;;  %s789_s5 = int_to_ptr.vmem [resolvable:$true] %s788_s5 }
 0x11d   :  { %v340_v38 = vmax.f32 %v300_v36, 0.0  ;;  %s987_s30 = scalar_lea.vmem %s789_s5, 32  ;;  %p992_p1 = scmp.lt.s32.totalorder %s789_s5, %s789_s5 }
 0x11e   :  { %v358_v39 = vpack.c.bf16 %v342_v37, %v341_v32  ;;  %p988_p0 = scmp.ne.s32.totalorder %s789_s5, %s987_s30  ;;  %p993_p2 = scmp.lt.s32.totalorder %s987_s30, %s987_s30 }
 0x11f   :  { %v357_v40 = vpack.c.bf16 %v340_v38, %v339_v35 }
 0x120   :  { %p994_p3 = por %p993_p2, %p992_p1 }
 0x121   :  { %965 = vmatprep.mubr.msk.bf16.mxu1 %vm398_vm1, %v357_v40 }
 0x122   :  { %966 = vmatmul.mubr.msk.bf16.gmra.mrb[28].mxu1 %vm398_vm1, %v358_v39  ;;  %p995_p4 = pnand %p994_p3, %p988_p0 }
 0x1bd   :  { %v939_v44 = vpop.f32.mrb[0].mxu1 }
 0x1be   :  { %v490_v45 = vadd.f32 %v939_v44, %v1250_v55  ;;  %v481_v46 = vpop.f32.mrb[1].mxu1 }
 0x1bf   :  { %v482_v47 = vadd.f32 %v1250_v55, %v481_v46  ;;  %v940_v48 = vpop.f32.mrb[2].mxu1 }
 0x1c0   :  { %v493_v49 = vadd.f32 %v940_v48, %v1250_v55  ;;  %v484_v50 = vpop.f32.mrb[3].mxu1  ;;  %v610_v52 = vmax.f32 %v490_v45, 0.0 }
 0x1c1   :  { %v485_v51 = vadd.f32 %v1250_v55, %v484_v50  ;;  %v608_v54 = vmax.f32 %v482_v47, 0.0 }
 0x1c2   :  { %v611_v53 = vmax.f32 %v493_v49, 0.0 }
 0x1c3   :  { %v609_v56 = vmax.f32 %v485_v51, 0.0 }
 0x1c4   :  { %v1256_v57 = vpack.c.bf16 %v611_v53, %v610_v52 }
 0x1c5   :  { %v1258_v58 = vpack.c.bf16 %v609_v56, %v608_v54  ;;  %v943_v59 = vpop.f32.mrb[4].mxu1 }
 0x1c6   :  { %v506_v60 = vadd.f32 %v943_v59, %v1250_v55  ;;  %v497_v61 = vpop.f32.mrb[5].mxu1 }
 0x1c7   :  { %v498_v62 = vadd.f32 %v1250_v55, %v497_v61  ;;  %v944_v63 = vpop.f32.mrb[6].mxu1 }
 0x1c8   :  { %v509_v0 = vadd.f32 %v944_v63, %v1250_v55  ;;  %v500_v1 = vpop.f32.mrb[7].mxu1  ;;  %v614_v3 = vmax.f32 %v506_v60, 0.0  ;;  %v671_v60 = vsel %vm101_vm0, %v1258_v58, 0  ;;  %v674_v58 = vsel %vm101_vm0, %v1256_v57, 0 }
 0x1c9   :  { %v501_v2 = vadd.f32 %v1250_v55, %v500_v1  ;;  %v612_v5 = vmax.f32 %v498_v62, 0.0 }
 0x1ca   :  { %v615_v4 = vmax.f32 %v509_v0, 0.0 }
 0x1cb   :  { %v613_v6 = vmax.f32 %v501_v2, 0.0 }
 0x1cc   :  { %v1264_v7 = vpack.c.bf16 %v615_v4, %v614_v3 }
 0x1cd   :  { %v1266_v8 = vpack.c.bf16 %v613_v6, %v612_v5  ;;  %v947_v9 = vpop.f32.mrb[8].mxu1 }
 0x1ce   :  { %v522_v10 = vadd.f32 %v947_v9, %v1250_v55  ;;  %v513_v11 = vpop.f32.mrb[9].mxu1 }
 0x1cf   :  { %v514_v12 = vadd.f32 %v1250_v55, %v513_v11  ;;  %v948_v13 = vpop.f32.mrb[10].mxu1 }
 0x1d0   :  { %v525_v14 = vadd.f32 %v948_v13, %v1250_v55  ;;  %v516_v15 = vpop.f32.mrb[11].mxu1  ;;  %v618_v17 = vmax.f32 %v522_v10, 0.0 }
 0x1d1   :  { %v517_v16 = vadd.f32 %v1250_v55, %v516_v15  ;;  %v616_v19 = vmax.f32 %v514_v12, 0.0 }
 0x1d2   :  { %v619_v18 = vmax.f32 %v525_v14, 0.0 }
 0x1d3   :  { %v617_v20 = vmax.f32 %v517_v16, 0.0 }
 0x1d4   :  { %v1272_v21 = vpack.c.bf16 %v619_v18, %v618_v17 }
 0x1d5   :  { %v1274_v22 = vpack.c.bf16 %v617_v20, %v616_v19  ;;  %v951_v23 = vpop.f32.mrb[12].mxu1 }
 0x1d6   :  { %v538_v24 = vadd.f32 %v951_v23, %v1250_v55  ;;  %v529_v25 = vpop.f32.mrb[13].mxu1 }
 0x1d7   :  { %v530_v26 = vadd.f32 %v1250_v55, %v529_v25  ;;  %v952_v27 = vpop.f32.mrb[14].mxu1 }
 0x1d8   :  { %v541_v28 = vadd.f32 %v952_v27, %v1250_v55  ;;  %v532_v29 = vpop.f32.mrb[15].mxu1  ;;  %v622_v31 = vmax.f32 %v538_v24, 0.0 }
 0x1d9   :  { %v533_v30 = vadd.f32 %v1250_v55, %v532_v29  ;;  %v620_v33 = vmax.f32 %v530_v26, 0.0  ;;  %v677_v26 = vsel %vm101_vm0, %v1266_v8, 0  ;;  %v680_v8 = vsel %vm101_vm0, %v1264_v7, 0 }
 0x1da   :  { %v623_v32 = vmax.f32 %v541_v28, 0.0 }
 0x1db   :  { %v621_v34 = vmax.f32 %v533_v30, 0.0 }
 0x1dc   :  { %v1280_v35 = vpack.c.bf16 %v623_v32, %v622_v31 }
 0x1dd   :  { %v1282_v36 = vpack.c.bf16 %v621_v34, %v620_v33  ;;  %v955_v37 = vpop.f32.mrb[16].mxu1 }
 0x1de   :  { %v554_v38 = vadd.f32 %v955_v37, %v1250_v55  ;;  %v545_v39 = vpop.f32.mrb[17].mxu1  ;;  %v692_v7 = vsel %vm101_vm0, %v1280_v35, 0 }
 0x1df   :  { %v546_v40 = vadd.f32 %v1250_v55, %v545_v39  ;;  %v956_v42 = vpop.f32.mrb[18].mxu1 }
 0x1e0   :  { %v557_v43 = vadd.f32 %v956_v42, %v1250_v55  ;;  %v548_v44 = vpop.f32.mrb[19].mxu1  ;;  %v626_v46 = vmax.f32 %v554_v38, 0.0  ;;  %v686_v42 = vsel %vm101_vm0, %v1272_v21, 0  ;;  %v661_v21 = vpop.permute.xlu0 %660 }
 0x1e1   :  { %v549_v45 = vadd.f32 %v1250_v55, %v548_v44  ;;  %v624_v48 = vmax.f32 %v546_v40, 0.0  ;;  %v683_v40 = vsel %vm101_vm0, %v1274_v22, 0  ;;  %v663_v22 = vlaneseq }
 0x1e2   :  { %v627_v47 = vmax.f32 %v557_v43, 0.0 }
 0x1e3   :  { %v625_v49 = vmax.f32 %v549_v45, 0.0  ;;  %v664_v43 = vshrl.u32 %v663_v22, 7  ;;  %v1012_v45 = vmov 1966171168   ;;  %vm779_vm2 = vcmp.lt.s32.totalorder %v663_v22, 256 }
 0x1e4   :  { %v650_v50 = vpack.c.bf16 %v627_v47, %v626_v46  ;;  %v763_v46 = vunpack.c.l.s4 %v1012_v45 }
 0x1e5   :  { %v649_v51 = vpack.c.bf16 %v625_v49, %v624_v48  ;;  %v959_v52 = vpop.f32.mrb[20].mxu1  ;;  %v665_v44 = vsub.s32 0, %v664_v43 }
 0x1e6   :  { %v570_v53 = vadd.f32 %v959_v52, %v1250_v55  ;;  %v561_v54 = vpop.f32.mrb[21].mxu1  ;;  %v764_v48 = vunpack.c.0.s8 %v763_v46 }
 0x1e7   :  { %v562_v56 = vadd.f32 %v1250_v55, %v561_v54  ;;  %969 = vmatprep.subr.msk.bf16.mxu0 %vm101_vm0, %v649_v51  ;;  %v960_v59 = vpop.f32.mrb[22].mxu1  ;;  %v666_v47 = vrot.slane %v661_v21, %v665_v44 }
 0x1e8   :  { %v630_v61 = vmax.f32 %v570_v53, 0.0  ;;  %v573_v62 = vadd.f32 %v960_v59, %v1250_v55  ;;  %876 = vmatpush3.bf16.xpose.msra.mxu0 %v671_v60  ;;  %v564_v63 = vpop.f32.mrb[23].mxu1  ;;  %v767_v52 = vsub.s32 %v764_v48, %v664_v43 }
 0x1e9   :  { %v628_v0 = vmax.f32 %v562_v56, 0.0  ;;  %v565_v1 = vadd.f32 %v1250_v55, %v564_v63  ;;  %970 = vmatprep.subr.msk.bf16.mxu0 %vm101_vm0, %v650_v50 }
 0x1ea   :  { %v631_v2 = vmax.f32 %v573_v62, 0.0 }
 0x1eb   :  { %v629_v3 = vmax.f32 %v565_v1, 0.0 }
 0x1ec   :  { %v652_v4 = vpack.c.bf16 %v631_v2, %v630_v61 }
 0x1ed   :  { %v651_v5 = vpack.c.bf16 %v629_v3, %v628_v0  ;;  %v963_v6 = vpop.f32.mrb[24].mxu1 }
 0x1ee   :  { %v586_v9 = vadd.f32 %v963_v6, %v1250_v55  ;;  %v577_v10 = vpop.f32.mrb[25].mxu1 }
 0x1ef   :  { %v578_v11 = vadd.f32 %v1250_v55, %v577_v10  ;;  %v964_v12 = vpop.f32.mrb[26].mxu1 }
 0x1f0   :  { %878 = vmatpush3.bf16.xpose.msra.mxu0 %v674_v58  ;;  %v634_v13 = vmax.f32 %v586_v9, 0.0  ;;  %v589_v14 = vadd.f32 %v964_v12, %v1250_v55  ;;  %v580_v15 = vpop.f32.mrb[27].mxu1 }
 0x1f1   :  { %971 = vmatprep.subr.msk.bf16.mxu0 %vm101_vm0, %v651_v5  ;;  %v632_v16 = vmax.f32 %v578_v11, 0.0  ;;  %v581_v17 = vadd.f32 %v1250_v55, %v580_v15 }
 0x1f2   :  { %v635_v18 = vmax.f32 %v589_v14, 0.0 }
 0x1f3   :  { %v633_v19 = vmax.f32 %v581_v17, 0.0 }
 0x1f4   :  { %v654_v20 = vpack.c.bf16 %v635_v18, %v634_v13 }
 0x1f5   :  { %v653_v23 = vpack.c.bf16 %v633_v19, %v632_v16  ;;  %v967_v24 = vpop.f32.mrb[28].mxu1 }
 0x1f6   :  { %v602_v57 = vadd.f32 %v967_v24, %v1250_v55  ;;  %v593_v25 = vpop.f32.mrb[29].mxu1 }
 0x1f7   :  { %v594_v27 = vadd.f32 %v1250_v55, %v593_v25  ;;  %v968_v28 = vpop.f32.mrb[30].mxu1 }
 0x1f8   :  { %880 = vmatpush3.bf16.xpose.msra.mxu0 %v677_v26  ;;  %v638_v29 = vmax.f32 %v602_v57, 0.0  ;;  %v605_v30 = vadd.f32 %v968_v28, %v1250_v55  ;;  %v596_v31 = vpop.f32.mrb[31].mxu1 }
 0x1f9   :  { %972 = vmatprep.subr.msk.bf16.mxu0 %vm101_vm0, %v652_v4  ;;  %v636_v32 = vmax.f32 %v594_v27, 0.0  ;;  %v597_v33 = vadd.f32 %v1250_v55, %v596_v31  ;;  %v689_v55 = vsel %vm101_vm0, %v1282_v36, 0 }
 0x1fa   :  { %v639_v34 = vmax.f32 %v605_v30, 0.0 }
 0x1fb   :  { %v637_v37 = vmax.f32 %v597_v33, 0.0 }
 0x1fc   :  { %v656_v38 = vpack.c.bf16 %v639_v34, %v638_v29 }
 0x1fd   :  { %v655_v39 = vpack.c.bf16 %v637_v37, %v636_v32 }
 0x200   :  { %882 = vmatpush3.bf16.xpose.msra.mxu0 %v680_v8 }
 0x201   :  { %973 = vmatprep.subr.msk.bf16.mxu0 %vm101_vm0, %v653_v23 }
 0x208   :  { %884 = vmatpush3.bf16.xpose.msra.mxu0 %v683_v40 }
 0x209   :  { %974 = vmatprep.subr.msk.bf16.mxu0 %vm101_vm0, %v654_v20 }
 0x210   :  { %886 = vmatpush3.bf16.xpose.msra.mxu0 %v686_v42 }
 0x211   :  { %975 = vmatprep.subr.msk.bf16.mxu0 %vm101_vm0, %v655_v39 }
 0x218   :  { %888 = vmatpush3.bf16.xpose.msra.mxu0 %v689_v55 }
 0x219   :  { %976 = vmatprep.subr.msk.bf16.mxu0 %vm101_vm0, %v656_v38 }
 0x220   :  { %890 = vmatpush3.bf16.xpose.msra.mxu0 %v692_v7 }
 0x227   :  { %892 = vmatmul.mubr.msk.bf16.vlgmr.msra.gmra.mrb[32].mxu0 %vm101_vm0, %v1243_v41 }
 0x2fa   :  { %v752_v49 = vpop.f32.mrb[32].mxu0 }
 0x2fb   :  { %v753_v36 = vadd.f32 %v752_v49, %v666_v47  ;;  %v754_v50 = vpop.f32.mrb[33].mxu0 }
 0x2fc   :  { %v755_v51 = vadd.f32 %v754_v50, %v666_v47  ;;  %v756_v53 = vpop.f32.mrb[34].mxu0 }
 0x2fd   :  { %v757_v54 = vpop.f32.mrb[35].mxu0 }
 0x2fe   :  { %v761_v35 = vcombine.low %v753_v36, %v755_v51 }
 0x300   :  { %v768_v56 = vrot.slane %v761_v35, %v767_v52 }
 0x302   :  { %v775_v41 = vrot.slane %v768_v56, %v767_v52 }
 0x304   :  { %781 = vst.msk [vmem:[#allocation3] sm:$0x3] %vm779_vm2, %v775_v41 }
 0x305   :  { %998 = shalt.err (!%p995_p4)
}
 0x306   :  { %s999_s10 = scalar_lea.hbm %s1345_s7, 32 }
 0x307   :  { %p1000_p5 = scmp.ne.s32.totalorder %s1345_s7, %s999_s10  ;;  %p1003_p6 = scmp.lt.u32.totalorder %s999_s10, %s1345_s7 }
 0x309   :  { %p1005_p7 = pnand %p1003_p6, %p1000_p5 }
 0x30b   :  { %1008 = shalt.err (!%p1005_p7)
}
 0x30c   :  { %791 = dma.vmem_to_hbm [thread:$0]  %s789_s5, 32, %s1345_s7, [#allocation4]  }
 0x30d   :  { %1009 = dma.done.wait [#allocation4], 32  }
 0x30e   :  { %1010 = vsyncadd [#allocation4], 4294967264 }
 0x30f   :  { %795 = vsyncpa [#allocation4], 1 }

</bundles_post_ra>
